<compile_context>
chip_gen: v7x
topology: tpu7x:2x2x1
jax: 0.10.0
libtpu: 0.0.40
codegen_flags: <defaults>
</compile_context>

<pallas_src>
import functools

import jax
import jax.numpy as jnp
from jax.experimental import pallas as pl
from jax.experimental.pallas import tpu as pltpu


# ------------------------------ hardware query -------------------------------


@functools.lru_cache(maxsize=None)
def _vmem_capacity_bytes():
    """One-time cached physical VMEM capacity (conservative v7x default)."""
    try:
        return int(pltpu.get_tpu_info().vmem_capacity_bytes)
    except Exception:
        return 64 << 20


# ---------------------------------- kernel -----------------------------------


def _upsample_kernel(x_ref, w_ref, b_ref, o_ref, *, U, compute_dtype):
    # x_ref: (tR, tT)     VMEM
    # w_ref: (1, tT*U)    VMEM   w_ref[0, t*U + k] == weight[k]  (pre-tiled row)
    # b_ref: (1, 1)       SMEM   bias scalar
    # o_ref: (tR, tT*U)   VMEM   lane-dense output block
    x = x_ref[...].astype(compute_dtype)                    # (tR, tT)
    tR, tT = x.shape
    # Interleave along lanes: xr[r, t*U + k] = x[r, t].
    xr = jnp.broadcast_to(x[:, :, None], (tR, tT, U)).reshape(tR, tT * U)
    w = w_ref[...]                                          # (1, tT*U) compute dtype
    bias = b_ref[0, 0].astype(compute_dtype)
    # out[r, t*U + k] = x[r, t] * weight[k] + bias   -- one dense lane-aligned store.
    o_ref[...] = (xr * w + bias).astype(o_ref.dtype)


# ---------------------------------- tiling -----------------------------------


def _choose_tiles(R, T, U, max_tile_elems):
    """Pick (tR, tT) for input blocks (tR, tT) and output blocks (tR, tT*U).

    Constraints: tR % 8 == 0 or tR == R; tT % 128 == 0 or tT == T (which keeps
    the output lane extent 128-aligned or full-extent).  tR * tT * U is kept
    under `max_tile_elems` so that double-buffered blocks plus the f32 compute
    temporaries fit comfortably in VMEM on every TPU generation.
    """
    max_tile_elems = max(int(max_tile_elems), 8 * 128 * U)
    # ---- T tile (lane axis) ----
    if T <= 128 or 8 * T * U <= max_tile_elems:
        tT = T
    else:
        cap = max(128, min((max_tile_elems // (8 * U)) // 128 * 128,
                           (T // 128) * 128))
        tT = cap
        for t in range(cap, 127, -128):        # prefer a divisor of T (no ragged block)
            if T % t == 0:
                tT = t
                break
        # If no divisor exists the last T block is ragged; Pallas masks the
        # out-of-bounds stores, which is safe for this elementwise kernel.
    # ---- row tile (sublane axis), given tT ----
    if R <= 8 or R * tT * U <= max_tile_elems:
        return R, tT
    cap = max(8, min((max_tile_elems // (tT * U)) // 8 * 8, (R // 8) * 8))
    tR = cap
    for r in range(cap, 7, -8):                # prefer a divisor of R
        if R % r == 0:
            tR = r
            break
    return tR, tT


# --------------------------------- wrapper ------------------------------------


def upsampling_forward(x, weight, bias, upsampling_factor, *, out_dtype=None,
                       compute_dtype=None, max_out_tile_bytes=None):
    """x: (B, C, T) -> (B, C, T * upsampling_factor).

    Matches nn.ConvTranspose2d(1, 1, kernel_size=(1, U), stride=(1, U), bias=True)
    applied to the unsqueezed (B, 1, C, T) input.  jit-friendly (no host sync).
    """
    B, C, T = x.shape
    U = int(upsampling_factor)
    if weight.size != U:
        raise ValueError(f"weight has {weight.size} taps, expected {U}")

    out_dtype = jnp.dtype(x.dtype if out_dtype is None else out_dtype)
    if compute_dtype is None:
        # bf16 math only when the whole pipeline is already bf16 (v6e/v7x VALU
        # is bf16-native); otherwise keep f32 math (v5e has no bf16 VALU and
        # the f32 reference semantics are preserved exactly).
        compute_dtype = (jnp.bfloat16
                         if (x.dtype == jnp.bfloat16 and out_dtype == jnp.bfloat16)
                         else jnp.float32)
    compute_dtype = jnp.dtype(compute_dtype)

    vmem_cap = _vmem_capacity_bytes()
    if max_out_tile_bytes is None:
        # ~16 MiB tiles on 128 MiB-VMEM parts (v5e/v6e), ~8 MiB on v7x (64 MiB).
        max_out_tile_bytes = min(16 << 20, vmem_cap // 8)
    max_tile_elems = int(max_out_tile_bytes) // 4          # budgeted in f32 terms

    R = B * C
    tR, tT = _choose_tiles(R, T, U, max_tile_elems)
    nR = pl.cdiv(R, tR)
    nT = pl.cdiv(T, tT)

    # VMEM budget: 2x double-buffered blocks + ~2 tile-sized compute
    # temporaries (the interleaved xr and the product), capped at 0.75 *
    # physical VMEM so it is valid on v7x's 64 MiB as well as 128 MiB parts.
    in_tile = tR * tT * jnp.dtype(x.dtype).itemsize
    w_tile = tT * U * compute_dtype.itemsize
    out_tile = tR * tT * U * out_dtype.itemsize
    temp_tile = tR * tT * U * compute_dtype.itemsize
    needed = 2 * (in_tile + w_tile + out_tile) + 2 * temp_tile + (2 << 20)
    cap = max(16 << 20, int(0.75 * vmem_cap))
    vmem_limit = int(min(max(needed, 16 << 20), cap))

    # Pre-tiled weight row (constant block): w_tiled[0, t*U + k] = weight[k].
    w_row = weight.reshape(U).astype(compute_dtype)
    w_tiled = jnp.tile(w_row, tT).reshape(1, tT * U)
    b_arr = bias.reshape(1, 1).astype(jnp.float32)          # SMEM scalar

    kernel = functools.partial(_upsample_kernel, U=U, compute_dtype=compute_dtype)
    out2d = pl.pallas_call(
        kernel,
        out_shape=jax.ShapeDtypeStruct((R, T * U), out_dtype),
        grid_spec=pltpu.PrefetchScalarGridSpec(
            num_scalar_prefetch=0,
            grid=(nR, nT),
            in_specs=[
                pl.BlockSpec((tR, tT), lambda r, t: (r, t)),
                pl.BlockSpec((1, tT * U), lambda r, t: (0, 0)),
                pl.BlockSpec(memory_space=pltpu.MemorySpace.SMEM),
            ],
            out_specs=pl.BlockSpec((tR, tT * U), lambda r, t: (r, t)),
        ),
        compiler_params=pltpu.CompilerParams(
            dimension_semantics=("parallel", "parallel"),
            vmem_limit_bytes=vmem_limit,
        ),
    )(x.reshape(R, T), w_tiled, b_arr)

    return out2d.reshape(B, C, T * U)


# ----------------------------------- demo -------------------------------------


if __name__ == "__main__":
    key = jax.random.PRNGKey(0)
    kx, kw, kb, kx2, kw2, kb2, kx3, kw3, kb3 = jax.random.split(key, 9)

    def ref_upsample(x, weight, bias, U):
        w = weight.reshape(U).astype(jnp.float32)
        b = bias.astype(jnp.float32).reshape(())
        B, C, T = x.shape
        return (x.astype(jnp.float32)[:, :, :, None] * w + b).reshape(B, C, T * U)

    # Test 1: small shapes matching the module docstring (B x C x T), one block.
    B, C, T, U = 2, 4, 16, 4
    x = jax.random.normal(kx, (B, C, T), dtype=jnp.float32)
    # ConvTranspose2d(1, 1, kernel_size=(1, U)) parameters: weight (1,1,1,U), bias (1,)
    weight = jax.random.normal(kw, (1, 1, 1, U), dtype=jnp.float32) * 0.1
    bias = jax.random.normal(kb, (1,), dtype=jnp.float32) * 0.1
    y = jax.block_until_ready(upsampling_forward(x, weight, bias, U))
    ref = ref_upsample(x, weight, bias, U)
    assert y.shape == (B, C, T * U), y.shape
    assert jnp.allclose(y, ref, atol=1e-6, rtol=1e-6)

    # Test 2: multi-step grid under jit.  The small tile budget forces
    # tR=8, tT=512 -> grid (2, 2) with 128-aligned, lane-dense blocks.
    B2, C2, T2, U2 = 2, 8, 1024, 16
    x2 = jax.random.normal(kx2, (B2, C2, T2), dtype=jnp.float32)
    weight2 = jax.random.normal(kw2, (1, 1, 1, U2), dtype=jnp.float32) * 0.1
    bias2 = jax.random.normal(kb2, (1,), dtype=jnp.float32) * 0.1
    fwd2 = jax.jit(functools.partial(upsampling_forward, upsampling_factor=U2,
                                     max_out_tile_bytes=256 * 1024))
    y2 = jax.block_until_ready(fwd2(x2, weight2, bias2))
    ref2 = ref_upsample(x2, weight2, bias2, U2)
    assert y2.shape == (B2, C2, T2 * U2), y2.shape
    assert jnp.allclose(y2, ref2, atol=1e-6, rtol=1e-6)

    # Test 3: bf16 output (halves the dominant HBM write stream); math stays f32.
    B3, C3, T3, U3 = 2, 4, 256, 8
    x3 = jax.random.normal(kx3, (B3, C3, T3), dtype=jnp.float32)
    weight3 = jax.random.normal(kw3, (1, 1, 1, U3), dtype=jnp.float32) * 0.1
    bias3 = jax.random.normal(kb3, (1,), dtype=jnp.float32) * 0.1
    y3 = jax.block_until_ready(
        upsampling_forward(x3, weight3, bias3, U3, out_dtype=jnp.bfloat16))
    ref3 = ref_upsample(x3, weight3, bias3, U3)
    assert y3.dtype == jnp.bfloat16
    assert jnp.allclose(y3.astype(jnp.float32), ref3, atol=1e-2, rtol=1e-2)

    print("KERNEL_OK")
</pallas_src>

<mosaic_0001>
module attributes {stable_mosaic.version = 11 : i64} {
  func.func @_upsample_kernel(%arg0: i32, %arg1: i32, %arg2: memref<8x16xf32, #tpu.memory_space<vmem>>, %arg3: memref<1x64xf32, #tpu.memory_space<vmem>>, %arg4: memref<1x1xf32, #tpu.memory_space<smem>>, %arg5: memref<8x64xf32, #tpu.memory_space<vmem>>) attributes {dimension_semantics = [#tpu.dimension_semantics<parallel>, #tpu.dimension_semantics<parallel>], iteration_bounds = array<i64: 1, 1>, scalar_prefetch = 0 : i64, scratch_operands = 0 : i64, tpu.core_type = #tpu.core_type<tc>, window_params = [{transform_indices = @transform_0, window_bounds = array<i64: 8, 16>}, {pipeline_mode = #tpu.pipeline_mode<synchronous>, transform_indices = @transform_1, window_bounds = array<i64: 1, 64>}, {transform_indices = @transform_2, window_bounds = array<i64: 1, 1>}, {transform_indices = @transform_3, window_bounds = array<i64: 8, 64>}]} {
    %c0 = arith.constant 0 : index
    %c0_0 = arith.constant 0 : index
    %0 = vector.load %arg2[%c0, %c0_0] : memref<8x16xf32, #tpu.memory_space<vmem>>, vector<8x16xf32>
    %1 = vector.shape_cast %0 : vector<8x16xf32> to vector<8x16x1xf32>
    %2 = vector.shape_cast %1 : vector<8x16x1xf32> to vector<8x16x1xf32>
    %3 = vector.broadcast %2 : vector<8x16x1xf32> to vector<8x16x4xf32>
    %4 = vector.shape_cast %3 : vector<8x16x4xf32> to vector<8x64xf32>
    %c0_1 = arith.constant 0 : index
    %c0_2 = arith.constant 0 : index
    %5 = vector.load %arg3[%c0_1, %c0_2] : memref<1x64xf32, #tpu.memory_space<vmem>>, vector<1x64xf32>
    %c0_3 = arith.constant 0 : index
    %c0_4 = arith.constant 0 : index
    %6 = memref.load %arg4[%c0_3, %c0_4] : memref<1x1xf32, #tpu.memory_space<smem>>
    %7 = vector.broadcast %5 : vector<1x64xf32> to vector<8x64xf32>
    %8 = arith.mulf %4, %7 : vector<8x64xf32>
    %9 = vector.broadcast %6 : f32 to vector<8x64xf32>
    %10 = arith.addf %8, %9 : vector<8x64xf32>
    %c0_5 = arith.constant 0 : index
    %c0_6 = arith.constant 0 : index
    %11 = vector.load %arg5[%c0_5, %c0_6] : memref<8x64xf32, #tpu.memory_space<vmem>>, vector<8x64xf32>
    tpu.vector_store %arg5[%c0_5, %c0_6], %10 {strides = array<i32>} : memref<8x64xf32, #tpu.memory_space<vmem>>, vector<8x64xf32>,
    return
  }
  func.func @transform_0(%arg0: i32, %arg1: i32) -> (i32, i32) {
    %c0_i32 = arith.constant 0 : i32
    return %arg0, %arg1 : i32, i32
  }
  func.func @transform_1(%arg0: i32, %arg1: i32) -> (i32, i32) {
    %c0_i32 = arith.constant 0 : i32
    %c0_i32_0 = arith.constant 0 : i32
    %c0_i32_1 = arith.constant 0 : i32
    return %c0_i32, %c0_i32_0 : i32, i32
  }
  func.func @transform_2(%arg0: i32, %arg1: i32) -> (i32, i32) {
    %c0_i32 = arith.constant 0 : i32
    %c0_i32_0 = arith.constant 0 : i32
    %c0_i32_1 = arith.constant 0 : i32
    return %c0_i32, %c0_i32_0 : i32, i32
  }
  func.func @transform_3(%arg0: i32, %arg1: i32) -> (i32, i32) {
    %c0_i32 = arith.constant 0 : i32
    return %arg0, %arg1 : i32, i32
  }
}

</mosaic_0001>

<bundles_post_ra>
// kernel: tpu_custom_call.1
= control target key start
LH: loop header
LB: loop body
LE: loop exit
PB: predicated region body
PF: predicated region fallthrough
CT: control target
= control target key end

     0   :  { %9 = vsyncpa [#allocation4], 0  ;;  %s703_s0 = inlined_call_operand.hbm [shape: f32[8,16], index: 0, kind: input, shape index: {}]   ;;  %s704_s1 = inlined_call_operand.vmem [shape: f32[1,64], index: 1, kind: input, shape index: {}]   ;;  %s705_s2 = inlined_call_operand.<no memory space> [shape: f32[1,1], index: 2, kind: input, shape index: {}]   ;;  %s706_s3 = inlined_call_operand.hbm [shape: f32[8,64], index: 3, kind: output, shape index: {}]  }
   0x1   :  { %10 = vsyncpa [#allocation5], 0  ;;  %s575_s12 = smov [#allocation3]   ;;  %s527_s16 = scalar_lea.hbm %s703_s0, 128 }
   0x2   :  { %s17_s13 = sshll.u32 %s575_s12, 4  ;;  %p528_p0 = scmp.ne.s32.totalorder %s703_s0, %s527_s16  ;;  %s18_s13 = int_to_ptr.vmem [resolvable:$true] %s17_s13 }
   0x3   :  { %p531_p1 = scmp.lt.u32.totalorder %s527_s16, %s703_s0 }
   0x5   :  { %p533_p2 = pnand %p531_p1, %p528_p0 }
   0x7   :  { %536 = shalt.err (!%p533_p2)
}
   0x8   :  { %s537_s21 = scalar_lea.vmem %s18_s13, 128  ;;  %p542_p4 = scmp.lt.s32.totalorder %s18_s13, %s18_s13 }
   0x9   :  { %p538_p3 = scmp.ne.s32.totalorder %s18_s13, %s537_s21  ;;  %p543_p5 = scmp.lt.s32.totalorder %s537_s21, %s537_s21 }
   0xb   :  { %p544_p6 = por %p543_p5, %p542_p4 }
   0xd   :  { %p545_p7 = pnand %p544_p6, %p538_p3 }
   0xf   :  { %548 = shalt.err (!%p545_p7)
}
  0x10   :  { %20 = dma.hbm_to_vmem [thread:$0]  %s703_s0, 128, %s18_s13, [#allocation4]  }
  0x11   :  { %571 = dma.done.wait [#allocation4], 128  }
  0x12   :  { %572 = vsyncadd [#allocation4], 4294967168  ;;  %v29_v0 = vlaneseq  ;;  %v28_v6 = vld [vmem:[#allocation3] sm:$0xff]  ;;  %v576_v21 = vmov 1983009808   ;;  %s578_s0 = smov 8  }
  0x13   :  { %v120_v22 = vunpack.c.l.s4 %v576_v21  ;;  %v577_v26 = vmov 1934713408   ;;  %s579_s24 = smov 4   ;;  %s580_s25 = smov 16   ;;  %vm449_vm0 = vcmask 31744   ;;  %vm451_vm1 = vcmask 64512  }
  0x14   :  { %v626_v1 = vshrl.u32 %v29_v0, 7  ;;  %v184_v27 = vunpack.c.l.s4 %v577_v26  ;;  %s581_s26 = smov 12   ;;  %s582_s27 = smov 24   ;;  %vm453_vm2 = vcmask 97280   ;;  %vm455_vm3 = vcmask 130048  }
  0x15   :  { %v121_v25 = vunpack.c.0.s8 %v120_v22  ;;  %s583_s28 = smov 20   ;;  %s584_s29 = smov 28   ;;  %vm457_vm4 = vcmask 162816   ;;  %vm459_vm5 = vcmask 195584   ;;  %vm461_vm6 = vcmask 228352  }
  0x16   :  { %v53_v2 = vsub.s32 2, %v626_v1  ;;  %v31_v3 = vsub.s32 0, %v626_v1  ;;  %v64_v4 = vsub.s32 3, %v626_v1  ;;  %v42_v5 = vsub.s32 1, %v626_v1  ;;  %s585_s30 = smov 32   ;;  %s586_s4 = smov 36  }
  0x17   :  { %v86_v11 = vsub.s32 5, %v626_v1  ;;  %v75_v12 = vsub.s32 4, %v626_v1  ;;  %v108_v15 = vsub.s32 7, %v626_v1  ;;  %v97_v16 = vsub.s32 6, %v626_v1  ;;  %s587_s5 = smov 40   ;;  %s588_s6 = smov 44  }
  0x18   :  { %v54_v7 = vrot.slane %v28_v6, %v53_v2  ;;  %v32_v8 = vrot.slane %v28_v6, %v31_v3  ;;  %v65_v9 = vrot.slane %v28_v6, %v64_v4  ;;  %v43_v10 = vrot.slane %v28_v6, %v42_v5  ;;  %s589_s7 = smov 48   ;;  %s590_s8 = smov 52  }
  0x19   :  { %v87_v13 = vrot.slane %v28_v6, %v86_v11  ;;  %v76_v14 = vrot.slane %v28_v6, %v75_v12  ;;  %v109_v17 = vrot.slane %v28_v6, %v108_v15  ;;  %v98_v18 = vrot.slane %v28_v6, %v97_v16  ;;  %s591_s9 = smov 56   ;;  %s592_s10 = smov 60  }
  0x1a   :  { %56 = vbcast.lane.b32.xlu1 %v54_v7, 256  ;;  %34 = vbcast.lane.b32.xlu0 %v32_v8, 256  ;;  %v637_v31 = vsub.s32 %v121_v25, %v626_v1  ;;  %v185_v33 = vunpack.c.0.s8 %v184_v27  ;;  %vm463_vm7 = vcmask 261120   ;;  %vm465_vm8 = vcmask 293888   ;;  %s593_s15 = smov [#allocation6]  }
  0x1b   :  { %vm467_vm9 = vcmask 326656   ;;  %vm469_vm10 = vcmask 359424   ;;  %vm471_vm11 = vcmask 392192   ;;  %vm473_vm12 = vcmask 424960   ;;  %s498_s16 = sshll.u32 %s593_s15, 4  ;;  %s499_s16 = int_to_ptr.vmem [resolvable:$true] %s498_s16 }
  0x1c   :  { %v646_v48 = vsub.s32 %v185_v33, %v626_v1  ;;  %vm475_vm13 = vcmask 457728   ;;  %vm477_vm14 = vcmask 490496   ;;  %vm490_vm15 = vcmask 523264   ;;  %s549_s17 = scalar_lea.vmem %s499_s16, 128  ;;  %p554_p9 = scmp.lt.s32.totalorder %s499_s16, %s499_s16 }
  0x1d   :  { %p550_p8 = scmp.ne.s32.totalorder %s499_s16, %s549_s17  ;;  %p555_p10 = scmp.lt.s32.totalorder %s549_s17, %s549_s17 }
  0x1e   :  { %67 = vbcast.lane.b32.xlu1 %v65_v9, 256  ;;  %45 = vbcast.lane.b32.xlu0 %v43_v10, 256 }
  0x1f   :  { %p556_p11 = por %p555_p10, %p554_p9 }
  0x21   :  { %p557_p12 = pnand %p556_p11, %p550_p8 }
  0x22   :  { %89 = vbcast.lane.b32.xlu1 %v87_v13, 256  ;;  %78 = vbcast.lane.b32.xlu0 %v76_v14, 256 }
  0x26   :  { %111 = vbcast.lane.b32.xlu1 %v109_v17, 256  ;;  %100 = vbcast.lane.b32.xlu0 %v98_v18, 256 }
  0x2a   :  { %49 = vbcast.lane.b32.xlu1 %v43_v10, 264  ;;  %38 = vbcast.lane.b32.xlu0 %v32_v8, 264 }
  0x2e   :  { %71 = vbcast.lane.b32.xlu1 %v65_v9, 264  ;;  %60 = vbcast.lane.b32.xlu0 %v54_v7, 264 }
  0x32   :  { %93 = vbcast.lane.b32.xlu1 %v87_v13, 264  ;;  %82 = vbcast.lane.b32.xlu0 %v76_v14, 264 }
  0x36   :  { %115 = vbcast.lane.b32.xlu1 %v109_v17, 264  ;;  %104 = vbcast.lane.b32.xlu0 %v98_v18, 264 }
  0x8c   :  { %v57_v19 = vpop.permute.xlu1 %56  ;;  %v35_v20 = vpop.permute.xlu0 %34 }
  0x8d   :  { %v117_v32 = vcombine.low %v35_v20, %v57_v19  ;;  %v118_v42 = vcombine.high %v35_v20, %v57_v19 }
  0x8f   :  { %v125_v43 = vrot.slane %v117_v32, %v637_v31  ;;  %v132_v56 = vrot.slane %v118_v42, %v637_v31 }
  0x90   :  { %v68_v23 = vpop.permute.xlu1 %67  ;;  %v46_v24 = vpop.permute.xlu0 %45 }
  0x91   :  { %v133_v28 = vcombine.low %v46_v24, %v68_v23  ;;  %v134_v34 = vcombine.high %v46_v24, %v68_v23 }
  0x93   :  { %v141_v35 = vrot.slane %v133_v28, %v637_v31  ;;  %v148_v49 = vrot.slane %v134_v34, %v637_v31 }
  0x94   :  { %v90_v29 = vpop.permute.xlu1 %89  ;;  %v79_v30 = vpop.permute.xlu0 %78 }
  0x95   :  { %v181_v50 = vcombine.low %v125_v43, %v141_v35  ;;  %v182_v51 = vcombine.high %v125_v43, %v141_v35  ;;  %v197_v60 = vcombine.low %v132_v56, %v148_v49  ;;  %v198_v7 = vcombine.high %v132_v56, %v148_v49 }
  0x97   :  { %v196_v63 = vrot.slane %v182_v51, %v646_v48  ;;  %v656_v0 = vrot.slane %v181_v50, %v646_v48  ;;  %v205_v10 = vrot.slane %v197_v60, %v646_v48  ;;  %v212_v19 = vrot.slane %v198_v7, %v646_v48 }
  0x98   :  { %v112_v36 = vpop.permute.xlu1 %111  ;;  %v101_v37 = vpop.permute.xlu0 %100 }
  0x99   :  { %v165_v38 = vcombine.low %v90_v29, %v112_v36  ;;  %v166_v39 = vcombine.high %v90_v29, %v112_v36  ;;  %v149_v40 = vcombine.low %v79_v30, %v101_v37  ;;  %v150_v41 = vcombine.high %v79_v30, %v101_v37 }
  0x9b   :  { %v173_v44 = vrot.slane %v165_v38, %v637_v31  ;;  %v180_v45 = vrot.slane %v166_v39, %v637_v31  ;;  %v157_v46 = vrot.slane %v149_v40, %v637_v31  ;;  %v164_v47 = vrot.slane %v150_v41, %v637_v31 }
  0x9c   :  { %v50_v52 = vpop.permute.xlu1 %49  ;;  %v39_v53 = vpop.permute.xlu0 %38 }
  0x9d   :  { %v213_v54 = vcombine.low %v157_v46, %v173_v44  ;;  %v214_v55 = vcombine.high %v157_v46, %v173_v44  ;;  %v229_v57 = vcombine.low %v164_v47, %v180_v45  ;;  %v230_v1 = vcombine.high %v164_v47, %v180_v45 }
  0x9f   :  { %v228_v58 = vrot.slane %v214_v55, %v646_v48  ;;  %v652_v59 = vrot.slane %v213_v54, %v646_v48  ;;  %v237_v4 = vrot.slane %v229_v57, %v646_v48  ;;  %v244_v13 = vrot.slane %v230_v1, %v646_v48 }
  0xa0   :  { %v72_v61 = vpop.permute.xlu1 %71  ;;  %v61_v62 = vpop.permute.xlu0 %60 }
  0xa1   :  { %v247_v2 = vcombine.low %v196_v63, %v228_v58  ;;  %v246_v3 = vcombine.high %v656_v0, %v652_v59  ;;  %v269_v5 = vcombine.low %v50_v52, %v72_v61  ;;  %v253_v6 = vcombine.low %v39_v53, %v61_v62 }
  0xa2   :  { %v249_v11 = vcombine.low %v205_v10, %v237_v4  ;;  %v248_v12 = vcombine.high %v196_v63, %v228_v58  ;;  %v245_v14 = vcombine.low %v656_v0, %v652_v59  ;;  %v270_v24 = vcombine.high %v50_v52, %v72_v61 }
  0xa3   :  { %394 = vrot.lane.b32.xlu1 %v247_v2, %s578_s0  ;;  %390 = vrot.lane.b32.xlu0 %v246_v3, %s579_s24  ;;  %v277_v15 = vrot.slane %v269_v5, %v637_v31  ;;  %v261_v16 = vrot.slane %v253_v6, %v637_v31  ;;  %v251_v25 = vcombine.low %v212_v19, %v244_v13 }
  0xa4   :  { %v94_v8 = vpop.permute.xlu1 %93  ;;  %v83_v9 = vpop.permute.xlu0 %82  ;;  %v250_v26 = vcombine.high %v205_v10, %v237_v4  ;;  %v254_v27 = vcombine.high %v39_v53, %v61_v62  ;;  %v284_v36 = vrot.slane %v270_v24, %v637_v31  ;;  %v252_v37 = vcombine.high %v212_v19, %v244_v13 }
  0xa5   :  { %v317_v28 = vcombine.low %v261_v16, %v277_v15  ;;  %v318_v39 = vcombine.high %v261_v16, %v277_v15 }
  0xa6   :  { %v268_v38 = vrot.slane %v254_v27, %v637_v31 }
  0xa7   :  { %402 = vrot.lane.b32.xlu1 %v249_v11, %s580_s25  ;;  %398 = vrot.lane.b32.xlu0 %v248_v12, %s581_s26  ;;  %v325_v40 = vrot.slane %v317_v28, %v646_v48  ;;  %v332_v47 = vrot.slane %v318_v39, %v646_v48 }
  0xa8   :  { %v116_v17 = vpop.permute.xlu1 %115  ;;  %v105_v18 = vpop.permute.xlu0 %104  ;;  %v333_v46 = vcombine.low %v268_v38, %v284_v36  ;;  %v334_v52 = vcombine.high %v268_v38, %v284_v36 }
  0xa9   :  { %v301_v20 = vcombine.low %v94_v8, %v116_v17  ;;  %v302_v21 = vcombine.high %v94_v8, %v116_v17  ;;  %v285_v22 = vcombine.low %v83_v9, %v105_v18  ;;  %v286_v23 = vcombine.high %v83_v9, %v105_v18 }
  0xaa   :  { %v341_v53 = vrot.slane %v333_v46, %v646_v48  ;;  %v348_v57 = vrot.slane %v334_v52, %v646_v48 }
  0xab   :  { %v309_v29 = vrot.slane %v301_v20, %v637_v31  ;;  %v293_v30 = vrot.slane %v285_v22, %v637_v31  ;;  %410 = vrot.lane.b32.xlu1 %v251_v25, %s582_s27  ;;  %406 = vrot.lane.b32.xlu0 %v250_v26, %s583_s28  ;;  %v316_v32 = vrot.slane %v302_v21, %v637_v31  ;;  %v507_v22 = vld [vmem:[%s704_s1] ss:$0 sm:$0xff]  ;;  %v488_v25 = vstv %s705_s2 }
  0xac   :  { %v300_v33 = vrot.slane %v286_v23, %v637_v31 }
  0xad   :  { %v349_v34 = vcombine.low %v293_v30, %v309_v29  ;;  %v350_v35 = vcombine.high %v293_v30, %v309_v29 }
  0xae   :  { %v365_v42 = vcombine.low %v300_v33, %v316_v32  ;;  %v366_v31 = vcombine.high %v300_v33, %v316_v32 }
  0xaf   :  { %v357_v41 = vrot.slane %v349_v34, %v646_v48  ;;  %414 = vrot.lane.b32.xlu0 %v252_v37, %s584_s29  ;;  %v364_v45 = vrot.slane %v350_v35, %v646_v48 }
  0xb0   :  { %v373_v50 = vrot.slane %v365_v42, %v646_v48  ;;  %v380_v55 = vrot.slane %v366_v31, %v646_v48 }
  0xb1   :  { %v382_v43 = vcombine.high %v325_v40, %v357_v41  ;;  %v381_v44 = vcombine.low %v325_v40, %v357_v41  ;;  %v383_v49 = vcombine.low %v332_v47, %v364_v45  ;;  %v384_v51 = vcombine.high %v332_v47, %v364_v45 }
  0xb2   :  { %v385_v54 = vcombine.low %v341_v53, %v373_v50  ;;  %v386_v56 = vcombine.high %v341_v53, %v373_v50  ;;  %v387_v58 = vcombine.low %v348_v57, %v380_v55  ;;  %v388_v60 = vcombine.high %v348_v57, %v380_v55 }
  0xb3   :  { %418 = vrot.lane.b32.xlu1 %v381_v44, %s585_s30  ;;  %422 = vrot.lane.b32.xlu0 %v382_v43, %s586_s4 }
  0xb7   :  { %426 = vrot.lane.b32.xlu1 %v383_v49, %s587_s5  ;;  %430 = vrot.lane.b32.xlu0 %v384_v51, %s588_s6 }
  0xbb   :  { %434 = vrot.lane.b32.xlu1 %v385_v54, %s589_s7  ;;  %438 = vrot.lane.b32.xlu0 %v386_v56, %s590_s8 }
  0xbf   :  { %442 = vrot.lane.b32.xlu1 %v387_v58, %s591_s9  ;;  %446 = vrot.lane.b32.xlu0 %v388_v60, %s592_s10 }
 0x115   :  { %v395_v61 = vpop.permute.xlu1 %394  ;;  %v391_v62 = vpop.permute.xlu0 %390 }
 0x116   :  { %v450_v63 = vsel %vm449_vm0, %v245_v14, %v391_v62 }
 0x117   :  { %v452_v48 = vsel %vm451_vm1, %v450_v63, %v395_v61 }
 0x119   :  { %v399_v1 = vpop.permute.xlu0 %398  ;;  %v403_v2 = vpop.permute.xlu1 %402 }
 0x11a   :  { %v454_v3 = vsel %vm453_vm2, %v452_v48, %v399_v1 }
 0x11b   :  { %v456_v5 = vsel %vm455_vm3, %v454_v3, %v403_v2 }
 0x11d   :  { %v407_v4 = vpop.permute.xlu0 %406  ;;  %v411_v6 = vpop.permute.xlu1 %410 }
 0x11e   :  { %v458_v7 = vsel %vm457_vm4, %v456_v5, %v407_v4 }
 0x11f   :  { %v460_v9 = vsel %vm459_vm5, %v458_v7, %v411_v6 }
 0x121   :  { %v415_v8 = vpop.permute.xlu0 %414 }
 0x122   :  { %v462_v10 = vsel %vm461_vm6, %v460_v9, %v415_v8 }
 0x125   :  { %v419_v59 = vpop.permute.xlu1 %418  ;;  %v423_v11 = vpop.permute.xlu0 %422 }
 0x126   :  { %v464_v0 = vsel %vm463_vm7, %v462_v10, %v419_v59 }
 0x127   :  { %v466_v12 = vsel %vm465_vm8, %v464_v0, %v423_v11 }
 0x129   :  { %v427_v13 = vpop.permute.xlu1 %426  ;;  %v431_v15 = vpop.permute.xlu0 %430 }
 0x12a   :  { %v468_v14 = vsel %vm467_vm9, %v466_v12, %v427_v13 }
 0x12b   :  { %v470_v16 = vsel %vm469_vm10, %v468_v14, %v431_v15 }
 0x12d   :  { %v435_v17 = vpop.permute.xlu1 %434  ;;  %v439_v19 = vpop.permute.xlu0 %438 }
 0x12e   :  { %v472_v18 = vsel %vm471_vm11, %v470_v16, %v435_v17 }
 0x12f   :  { %v474_v20 = vsel %vm473_vm12, %v472_v18, %v439_v19 }
 0x131   :  { %v443_v21 = vpop.permute.xlu1 %442  ;;  %v447_v24 = vpop.permute.xlu0 %446 }
 0x132   :  { %v476_v23 = vsel %vm475_vm13, %v474_v20, %v443_v21 }
 0x133   :  { %v478_v26 = vsel %vm477_vm14, %v476_v23, %v447_v24 }
 0x134   :  { %v487_v27 = vmul.f32 %v507_v22, %v478_v26 }
 0x136   :  { %v489_v28 = vadd.f32 %v488_v25, %v487_v27 }
 0x138   :  { %491 = vst.msk [vmem:[#allocation6] sm:$0xff] %vm490_vm15, %v489_v28 }
 0x139   :  { %560 = shalt.err (!%p557_p12)
}
 0x13a   :  { %s561_s19 = scalar_lea.hbm %s706_s3, 128 }
 0x13b   :  { %p562_p13 = scmp.ne.s32.totalorder %s706_s3, %s561_s19  ;;  %p565_p0 = scmp.lt.u32.totalorder %s561_s19, %s706_s3 }
 0x13d   :  { %p567_p1 = pnand %p565_p0, %p562_p13 }
 0x13f   :  { %570 = shalt.err (!%p567_p1)
}
 0x140   :  { %501 = dma.vmem_to_hbm [thread:$0]  %s499_s16, 128, %s706_s3, [#allocation5]  }
 0x141   :  { %573 = dma.done.wait [#allocation5], 128  }
 0x142   :  { %574 = vsyncadd [#allocation5], 4294967168 }
 0x143   :  { %505 = vsyncpa [#allocation4], 1 }
 0x144   :  { %506 = vsyncpa [#allocation5], 1 }

</bundles_post_ra>
